<compile_context>
chip_gen: v5e
topology: v5e:2x2
jax: 0.10.0
libtpu: 0.0.40
codegen_flags: <defaults>
</compile_context>

<pallas_src>
import math

import jax
import jax.numpy as jnp
from jax.experimental import pallas as pl
from jax.experimental.pallas import tpu as pltpu

_LANE = 128
_MAX_BLOCK_BYTES = 2 * 1024 * 1024  # per-block cap: safe on v5e/v6e/v7x
_MAX_LANE_TILE = 2048               # lane-dim cap (elements)


def _copy_kernel(x_ref, o_ref):
    # Pure lane-dense tile copy; the flatten itself is a free metadata reshape
    # done in the wrapper.
    o_ref[...] = x_ref[...]


def _sublane_unit(dtype):
    """Dtype-aware sublane granularity (sub-32-bit dtypes pack along sublanes)."""
    itemsize = jnp.dtype(dtype).itemsize
    if itemsize >= 4:
        return 8
    if itemsize == 2:
        return 16
    return 32


def _choose_slab(total, unit):
    """Pick (rows, L): L a multiple of 128 dividing `total`, preferring a row
    count that is a multiple of the sublane unit and large enough to split the
    grid into >=2 parallel steps. Returns None if no lane-dense factorization
    exists (caller falls back to (n, flat))."""
    if total % _LANE != 0:
        return None
    candidates = [L for L in range(_LANE, min(total, _MAX_LANE_TILE) + 1, _LANE)
                  if total % L == 0]
    if not candidates:
        return None
    preds = (
        lambda L: (total // L) % unit == 0 and (total // L) >= 2 * unit,
        lambda L: (total // L) % unit == 0,
        lambda L: True,
    )
    for pred in preds:
        good = [L for L in candidates if pred(L)]
        if good:
            L = max(good)          # widest lane dim that satisfies the predicate
            return total // L, L
    return None


def _pick_lane_tile(dim, cap):
    """Lane tile: full extent if it fits (always legal), else a 128-multiple."""
    if dim <= cap and dim % _LANE != 0:
        return dim
    t = min(dim, cap)
    return max(_LANE, (t // _LANE) * _LANE)


def _row_tile(rows, unit, max_rows_per_block):
    """Sublane tile: a multiple of `unit` (or full extent), capped by the VMEM
    budget, biased so the (parallel) row axis has >=2 grid steps when there is
    enough work — keeps both v7x TensorCores busy."""
    if rows <= unit:
        return rows                              # full extent: always legal
    cap = max(unit, (max_rows_per_block // unit) * unit)
    tn = min((rows // unit) * unit, cap)
    if rows >= 2 * unit and tn * 2 > rows:
        tn = max(unit, (((rows + 1) // 2) // unit) * unit)
    return tn


def flatten_layer(x, *, use_pallas=True):
    """Pallas equivalent of FlattenLayer.forward: (N, ...) -> (N, prod(...))."""
    n = x.shape[0]
    flat = math.prod(x.shape[1:]) if x.ndim > 1 else 1

    if not use_pallas:
        # Optimal path when fusion is not needed: 0 bytes moved.
        return x.reshape(n, flat)

    total = n * flat
    itemsize = jnp.dtype(x.dtype).itemsize
    unit = _sublane_unit(x.dtype)

    slab = _choose_slab(total, unit)
    if slab is not None:
        rows, width = slab
        tf = width                                  # already <= 2048, 128-multiple
    else:
        rows, width = n, flat                       # fallback: no 128 factorization
        tf = _pick_lane_tile(width, _MAX_LANE_TILE)

    # Free, row-major metadata reshape (== torch's X.view semantics).
    x2 = x.reshape(rows, width)

    max_rows = max(unit, _MAX_BLOCK_BYTES // max(1, tf * itemsize))
    tn = _row_tile(rows, unit, max_rows)

    grid = (pl.cdiv(rows, tn), pl.cdiv(width, tf))

    out = pl.pallas_call(
        _copy_kernel,
        out_shape=jax.ShapeDtypeStruct((rows, width), x.dtype),
        grid_spec=pltpu.PrefetchScalarGridSpec(
            num_scalar_prefetch=0,
            grid=grid,
            in_specs=[pl.BlockSpec((tn, tf), lambda i, j: (i, j))],
            out_specs=pl.BlockSpec((tn, tf), lambda i, j: (i, j)),
        ),
        compiler_params=pltpu.CompilerParams(
            # Both axes independent -> shard across TensorCores on megacore
            # chips; harmless on single-TC generations.
            dimension_semantics=("parallel", "parallel"),
        ),
        # Identical block mapping in/out -> safe in-place aliasing; lets XLA
        # donate the HBM buffer when the caller donates x.
        input_output_aliases={0: 0},
        cost_estimate=pl.CostEstimate(
            flops=0, transcendentals=0, bytes_accessed=2 * total * itemsize),
    )(x2)

    # Free metadata reshape back to the (N, flat) view torch returns.
    return out.reshape(n, flat)


if __name__ == "__main__":
    key = jax.random.PRNGKey(0)
    # Small NCHW input consistent with a DenseNet feature map feeding the head.
    x = jax.random.normal(key, (2, 4, 16, 16), dtype=jnp.float32)

    y = flatten_layer(x)
    y = jax.block_until_ready(y)

    # Reference: torch's X.view(N, -1) == row-major reshape.
    y_ref = x.reshape(x.shape[0], -1)

    assert y.shape == (2, 4 * 16 * 16), y.shape
    assert y.dtype == x.dtype
    assert jnp.array_equal(y, y_ref), "Pallas flatten mismatch vs reference reshape"

    print("KERNEL_OK")
</pallas_src>

<mosaic_0001>
module attributes {stable_mosaic.version = 11 : i64} {
  func.func @_copy_kernel(%arg0: i32, %arg1: i32, %arg2: memref<8x128xf32, #tpu.memory_space<vmem>>, %arg3: memref<8x128xf32, #tpu.memory_space<vmem>>) attributes {dimension_semantics = [#tpu.dimension_semantics<parallel>, #tpu.dimension_semantics<parallel>], iteration_bounds = array<i64: 2, 1>, scalar_prefetch = 0 : i64, scratch_operands = 0 : i64, tpu.core_type = #tpu.core_type<tc>, window_params = [{transform_indices = @transform_0, window_bounds = array<i64: 8, 128>}, {transform_indices = @transform_1, window_bounds = array<i64: 8, 128>}]} {
    %c0 = arith.constant 0 : index
    %c0_0 = arith.constant 0 : index
    %0 = vector.load %arg2[%c0, %c0_0] : memref<8x128xf32, #tpu.memory_space<vmem>>, vector<8x128xf32>
    %c0_1 = arith.constant 0 : index
    %c0_2 = arith.constant 0 : index
    %1 = vector.load %arg3[%c0_1, %c0_2] : memref<8x128xf32, #tpu.memory_space<vmem>>, vector<8x128xf32>
    tpu.vector_store %arg3[%c0_1, %c0_2], %0 {strides = array<i32>} : memref<8x128xf32, #tpu.memory_space<vmem>>, vector<8x128xf32>,
    return
  }
  func.func @transform_0(%arg0: i32, %arg1: i32) -> (i32, i32) {
    %c0_i32 = arith.constant 0 : i32
    return %arg0, %arg1 : i32, i32
  }
  func.func @transform_1(%arg0: i32, %arg1: i32) -> (i32, i32) {
    %c0_i32 = arith.constant 0 : i32
    return %arg0, %arg1 : i32, i32
  }
}

</mosaic_0001>

<bundles_post_ra>
// kernel: tpu_custom_call.1
= control target key start
LH: loop header
LB: loop body
LE: loop exit
PB: predicated region body
PF: predicated region fallthrough
CT: control target
= control target key end

     0   :  { %6 = vsyncpa [#allocation3], 0  ;;  %s569_s0 = inlined_call_operand.hbm [shape: f32[16,128], index: 0, kind: input, shape index: {}, may-alias: {0,1}]   ;;  %s570_s1 = inlined_call_operand.hbm [shape: f32[16,128], index: 1, kind: output, shape index: {}, may-alias: {0,1}]  }
   0x1   :  { %8 = vsyncpa [#allocation3 + $0x1], 0 }
   0x2   :  { %9 = vsyncpa [#allocation4], 0 }
   0x3   :  { %11 = vsyncpa [#allocation4 + $0x1], 0  ;;  %s449_s6 = smov 0   ;;  %s451_s7 = smov 0  }
   0x4   :  { %s453_s8 = smov 0   ;;  %s455_s9 = smov 0  }
   0x5   :  { %s457_s10 = smov 0   ;;  %s459_s11 = smov 0  }
   0x6 LB: > { %s250_s12 = sadd.s32 4294967295, %s437_s11   ;;  %s251_s13 = sadd.s32 4294967294, %s437_s11   ;;  %s437_s11 = sphi %s459_s11, %s17_s11   ;;  %s433_s10 = sphi %s457_s10, %s579_s10   ;;  %s429_s9 = sphi %s455_s9, %s578_s9   ;;  %s425_s8 = sphi %s453_s8, %s577_s8   ;;  %s421_s7 = sphi %s451_s7, %s576_s7   ;;  %s417_s6 = sphi %s449_s6, %s575_s6  }
   0x7   : > { %s29_s14 = sadd.s32 1, %s433_s10  ;;  %s38_s15 = sadd.s32 1, %s425_s8 }
   0x8   : > { %p31_p0 = scmp.ge.s32.totalorder %s29_s14, 2  ;;  %p45_p1 = scmp.ne.s32.totalorder %s425_s8, %s421_s7 }
   0x9   : > { %p46_p2 = scmp.eq.s32.totalorder %s437_s11, 0  ;;  %p51_p3 = scmp.ne.s32.totalorder %s421_s7, %s417_s6 }
   0xa   : > { %s581_s14 = smov (%p31_p0, %s29_s14), 0  ;;  %p52_p5 = scmp.eq.s32.totalorder %s250_s12, 0 }
   0xb   : > { %p490_p4 = por %p46_p2, %p45_p1  ;;  %s33_s17 = ssub.s32 %s433_s10, %s581_s14 }
   0xc   : > { %p77_p6 = scmp.eq.s32.totalorder %s250_s12, 1  ;;  %p36_p7 = scmp.eq.s32.totalorder %s33_s17, 0 }
   0xd   : > { %p496_p8 = por %p52_p5, %p51_p3  ;;  %p83_p10 = scmp.eq.s32.totalorder %s251_s13, 1 }
   0xe   : > { %p500_p9 = por %p77_p6, %p45_p1  ;;  %p253_p12 = scmp.ge.s32.totalorder %s437_s11, 2 }
   0xf   : > { %s505_s20 = scalar_select %p36_p7, %s425_s8, %s38_s15  }
  0x10   : > { %p507_p11 = por %p83_p10, %p51_p3  ;;  %p275_p13 = scmp.lt.s32.totalorder %s437_s11, 2 }
  0x11   : > { %s103_s22 = sand.u32 1, %s425_s8   ;;  %s255_s24 = sshll.u32 %s433_s10, 3 }
  0x12   : > { %s254_s23 = sshll.u32 %s103_s22, 3  ;;  %s112_s27 = scalar_lea.hbm %s569_s0, %s255_s24 }
  0x13   : > { %s107_s28 = scalar_lea.vmem [#allocation2], %s254_s23  ;;  %s114_s30 = sshll.u32 %s112_s27, 4  ;;  %s115_s30 = int_to_ptr.hbm [resolvable:$true] %s114_s30 }
  0x14   : > { %s116_s29 = sshll.u32 %s107_s28, 4  ;;  %p268_p0 = pnand %p275_p13, %p490_p4  ;;  %s117_s29 = int_to_ptr.vmem [resolvable:$true] %s116_s29 }
  0x15   : > { %p256_p1 = scmp.ge.s32.totalorder %s437_s11, 1  ;;  %p121_p2 = scmp.lt.s32.totalorder %s437_s11, 3 }
  0x16   : > { %s104_s2 = scalar_lea.sflag [#allocation3], %s103_s22 }
  0x17   : > { %270 = dma.hbm_to_vmem [thread:$0]  (!%p268_p0), %s115_s30, 128, %s117_s29, %s104_s2  }
  0x18   : > { %p122_p3 = pnand %p256_p1, %p121_p2 }
  0x19   : > { %s523_s3 = sand.u32 (!%p122_p3), 1, %s421_s7  }
  0x1a   : > { %125 = sbr.rel (%p122_p3) target bundleno = 47 (0x2f), region = 24  ;;  %s257_s4 = sshll.u32 (!%p122_p3), %s523_s3, 3 }
  0x1b   : > { %s128_s5 = scalar_lea.sflag (!%p122_p3), [#allocation3], %s523_s3  ;;  %s131_s12 = scalar_lea.vmem (!%p122_p3), [#allocation2], %s257_s4 }
  0x1f   : > { %408 = dma.done.wait (%p496_p8), %s128_s5, 128  }
  0x20   : > { %410 = vsyncadd (%p496_p8), %s128_s5, 4294967168  ;;  %s260_s13 = sshll.u32 %s429_s9, 3  ;;  %s150_s22 = scalar_lea.vmem [#allocation5], %s257_s4  ;;  %v151_v0 = vld [vmem:[%s131_s12] sm:$0xff] }
  0x21   : > { %s165_s17 = scalar_lea.hbm %s570_s1, %s260_s13  ;;  %s167_s23 = sshll.u32 %s150_s22, 4  ;;  %152 = vst [vmem:[%s150_s22] sm:$0xff] %v151_v0  ;;  %s168_s23 = int_to_ptr.vmem [resolvable:$true] %s167_s23 }
  0x22   : > { %s169_s24 = sshll.u32 %s165_s17, 4  ;;  %s154_s25 = scalar_lea.sflag [#allocation4], %s523_s3  ;;  %s170_s24 = int_to_ptr.hbm [resolvable:$true] %s169_s24 }
  0x23   : > { %s369_s26 = sshra.s32 %s170_s24, 4  ;;  %s375_s28 = scalar_lea.hbm %s570_s1, 16  ;;  %s370_s26 = int_to_ptr.hbm [resolvable:$true] %s369_s26 }
  0x24   : > { %s371_s18 = scalar_lea.hbm %s370_s26, 8  ;;  %p376_p7 = scmp.lt.s32.totalorder %s370_s26, %s570_s1 }
  0x25   : > { %p372_p4 = scmp.ne.s32.totalorder %s370_s26, %s371_s18  ;;  %p377_p8 = scmp.lt.s32.totalorder %s375_s28, %s371_s18 }
  0x27   : > { %p373_p5 = pnand %p372_p4, %p500_p9  ;;  %p378_p10 = por %p377_p8, %p376_p7 }
  0x29   : > { %p374_p6 = pneg %p373_p5 }
  0x2b   : > { %p379_p13 = pnand %p378_p10, %p374_p6 }
  0x2d   : > { %382 = shalt.err (!%p379_p13)
}
  0x2e   : > { %265 = dma.vmem_to_hbm [thread:$0]  (%p500_p9), %s168_s23, 128, %s170_s24, %s154_s25  }
  0x2f PF: > { %s181_s2 = sand.u32 1, %s417_s6   ;;  %p272_p0 = pnand %p253_p12, %p507_p11 }
  0x30   : > { %s182_s3 = scalar_lea.sflag [#allocation4], %s181_s2 }
  0x31   : > { %p273_p1 = pneg %p272_p0 }
  0x33   : > { %412 = dma.done.wait (%p273_p1), %s182_s3, 128  }
  0x34   : > { %414 = vsyncadd (%p273_p1), %s182_s3, 4294967168  ;;  %s17_s11 = sadd.s32 1, %s437_s11   ;;  %s575_s6 = smov %s421_s7 }
  0x35   : > { %p14_p2 = scmp.ge.s32.totalorder %s17_s11, 4   ;;  %s576_s7 = smov %s425_s8 }
  0x36   : > { %s577_s8 = smov %s505_s20  ;;  %s578_s9 = smov %s433_s10 }
  0x37   : > { %s579_s10 = smov %s581_s14  ;;  %16 = sbr.rel (!%p14_p2) target bundleno = 6 (0x6), region = 69 }
  0x3c   :  { %188 = vsyncpa [#allocation3], 1 }
  0x3d   :  { %190 = vsyncpa [#allocation3 + $0x1], 1 }
  0x3e   :  { %191 = vsyncpa [#allocation4], 1 }
  0x3f   :  { %193 = vsyncpa [#allocation4 + $0x1], 1 }

</bundles_post_ra>
